<compile_context>
chip_gen: v7x
topology: tpu7x:2x2x1
jax: 0.10.0
libtpu: 0.0.40
codegen_flags: <defaults>
</compile_context>

<pallas_src>
import functools

import jax
import jax.numpy as jnp
from jax import lax
from jax.experimental import pallas as pl
from jax.experimental.pallas import tpu as pltpu


def _round_up(x, m):
    return (x + m - 1) // m * m


def _two_tensorcores():
    # Only chips with 2 TensorCores visible to a single Pallas call (v7x) benefit
    # from the leading "parallel" axis; single-TC v5e/v6e keep nc=1.
    try:
        kind = jax.devices()[0].device_kind.lower()
    except Exception:
        return False
    return "v7" in kind


def _bce_dice_kernel(x_ref, t_ref, bce_ref, inter_ref, denom_ref,
                     *, gc, td, dr_valid, first_masked_block, need_mask):
    # x_ref/t_ref: (M, td) tile of the folded (M, dr) slab.
    # bce_ref/inter_ref/denom_ref: (M, 1) per-row accumulators, resident across k.
    c = pl.program_id(0)
    k = pl.program_id(1)

    @pl.when(k == 0)
    def _():
        bce_ref[...] = jnp.zeros_like(bce_ref)
        inter_ref[...] = jnp.zeros_like(inter_ref)
        denom_ref[...] = jnp.zeros_like(denom_ref)

    x = x_ref[...].astype(jnp.float32)
    t = t_ref[...].astype(jnp.float32)

    # Shared transcendental: e = exp(-|x|) feeds both the BCE log1p term and sigmoid.
    e = jnp.exp(-jnp.abs(x))
    # Stable BCE with logits: max(x, 0) - x*t + log(1 + exp(-|x|))
    bce_elem = jnp.maximum(x, 0.0) - x * t + jnp.log1p(e)
    # sigmoid(x) = [x>=0 ? 1 : e] * 1/(1+e); the approximate EUP reciprocal skips the
    # Newton-refinement VPU FMAs and stays far inside the loss tolerance.
    sig = jnp.where(x >= 0.0, 1.0, e) * pl.reciprocal(1.0 + e, approx=True)

    def accumulate(bce_e, inter_e, denom_e):
        # Per-row (lane-axis) partial sums into the resident accumulators.
        bce_ref[...] += jnp.sum(bce_e, axis=1, keepdims=True)
        inter_ref[...] += jnp.sum(inter_e, axis=1, keepdims=True)
        denom_ref[...] += jnp.sum(denom_e, axis=1, keepdims=True)

    if need_mask:
        # Only the one ragged block pays for iota/compare/select.
        bidx = c * gc + k

        @pl.when(bidx < first_masked_block)
        def _():
            accumulate(bce_elem, sig * t, sig + t)

        @pl.when(bidx >= first_masked_block)
        def _():
            cols = bidx * td + lax.broadcasted_iota(jnp.int32, x.shape, 1)
            valid = cols < dr_valid
            zero = jnp.zeros_like(x)
            # No wrapper padding, so t itself is garbage past dr_valid: mask the
            # combined terms, not just sig (select discards NaN/Inf garbage safely).
            accumulate(jnp.where(valid, bce_elem, zero),
                       jnp.where(valid, sig * t, zero),
                       jnp.where(valid, sig + t, zero))
    else:
        accumulate(bce_elem, sig * t, sig + t)


def bce_dice_loss(logits, target, *, smooth=1e-05):
    """logits, target: (N, C, H, W) arrays (any float/int dtype). Returns scalar f32.

    Inputs are read from HBM in their native dtype and cast to f32 in VMEM, so
    bf16 logits / bool-int8 targets halve (or quarter) HBM traffic.
    """
    n = logits.shape[0]
    d_true = logits.size // n                    # per-sample element count (C*H*W)

    # Fold part of D into the sublane axis so small N still fills 8 sublanes.
    fold = 1
    for f in (8, 4, 2):
        if d_true % f == 0:
            fold = f
            break
    m_rows = n * fold
    dr = d_true // fold

    x2d = logits.reshape(m_rows, dr)
    t2d = target.reshape(m_rows, dr)

    itemsize = max(jnp.dtype(x2d.dtype).itemsize, jnp.dtype(t2d.dtype).itemsize)
    bytes_per_col = m_rows * itemsize

    # Tile width: target ~6 MiB / input / step; 2 inputs x 2 pipeline buffers must
    # stay inside ~28 MiB of the 32 MiB scoped VMEM limit; keep per-row contiguous
    # DMA runs >= 2 KiB.  (Very large m_rows would want row-axis tiling instead of
    # narrow column tiles; not needed at these shapes.)
    TILE_BYTES = 6 << 20
    BUF_BYTES = 28 << 20
    td_fit = max(128, (BUF_BYTES // (4 * bytes_per_col)) // 128 * 128)
    td_target = max((TILE_BYTES // bytes_per_col) // 128 * 128,
                    _round_up(max(2048 // itemsize, 128), 128))
    td = min(td_target, td_fit, _round_up(dr, 128))

    n_blocks = pl.cdiv(dr, td)
    # 2-way TensorCore split only on v7x-class chips and only when tiles split
    # evenly (so no block is ever fully out of bounds); otherwise a plain
    # sequential reduction.
    nc = 2 if (_two_tensorcores() and n_blocks >= 2 and n_blocks % 2 == 0) else 1
    gc = n_blocks // nc

    need_mask = (dr % td) != 0
    kernel = functools.partial(
        _bce_dice_kernel, gc=gc, td=td, dr_valid=dr,
        first_masked_block=dr // td, need_mask=need_mask)

    in_spec = pl.BlockSpec((m_rows, td), lambda c, k: (0, c * gc + k))
    acc_spec = pl.BlockSpec((None, m_rows, 1), lambda c, k: (c, 0, 0))
    acc_shape = jax.ShapeDtypeStruct((nc, m_rows, 1), jnp.float32)

    cost = pl.CostEstimate(
        flops=12 * m_rows * dr,
        transcendentals=3 * m_rows * dr,
        bytes_accessed=2 * m_rows * dr * itemsize + 3 * nc * m_rows * 4,
    )

    bce_rows, inter_rows, denom_rows = pl.pallas_call(
        kernel,
        out_shape=(acc_shape, acc_shape, acc_shape),
        grid=(nc, gc),
        in_specs=[in_spec, in_spec],
        out_specs=(acc_spec, acc_spec, acc_spec),
        compiler_params=pltpu.CompilerParams(
            dimension_semantics=("parallel", "arbitrary"),
            vmem_limit_bytes=32 * 1024 * 1024,
        ),
        cost_estimate=cost,
    )(x2d, t2d)

    # Tiny epilogue in plain JAX: combine per-core / per-row partials.
    bce = jnp.sum(bce_rows) / jnp.float32(n * d_true)
    inter = jnp.sum(inter_rows, axis=(0, 2)).reshape(n, fold).sum(axis=1)
    denom = jnp.sum(denom_rows, axis=(0, 2)).reshape(n, fold).sum(axis=1)
    dice = (2.0 * inter + smooth) / (denom + smooth)
    dice_loss = 1.0 - jnp.sum(dice) / jnp.float32(n)
    return 0.5 * bce + dice_loss


if __name__ == "__main__":
    key = jax.random.PRNGKey(0)
    k1, k2 = jax.random.split(key)
    # Segmentation-style input: N=2, C=4, H=W=16
    logits = jax.random.normal(k1, (2, 4, 16, 16), dtype=jnp.float32)
    target = (jax.random.uniform(k2, (2, 4, 16, 16)) > 0.5).astype(jnp.float32)

    loss = bce_dice_loss(logits, target)
    jax.block_until_ready(loss)

    # Pure-JAX reference (same math as the PyTorch module)
    x = logits.reshape(2, -1).astype(jnp.float32)
    t = target.reshape(2, -1).astype(jnp.float32)
    bce_ref = jnp.mean(jnp.maximum(x, 0) - x * t + jnp.log1p(jnp.exp(-jnp.abs(x))))
    sig = jax.nn.sigmoid(x)
    inter = jnp.sum(sig * t, axis=1)
    dice = (2.0 * inter + 1e-5) / (jnp.sum(sig, axis=1) + jnp.sum(t, axis=1) + 1e-5)
    ref = 0.5 * bce_ref + (1.0 - jnp.sum(dice) / 2.0)

    # Slightly relaxed tolerance to cover the approximate EUP reciprocal in sigmoid.
    assert jnp.allclose(loss, ref, atol=1e-3, rtol=1e-3), (loss, ref)

    print("KERNEL_OK")
</pallas_src>

<mosaic_0001>
module attributes {stable_mosaic.version = 11 : i64} {
  func.func @_bce_dice_kernel(%arg0: i32, %arg1: i32, %arg2: memref<16x128xf32, #tpu.memory_space<vmem>>, %arg3: memref<16x128xf32, #tpu.memory_space<vmem>>, %arg4: memref<1x16x1xf32, #tpu.memory_space<vmem>>, %arg5: memref<1x16x1xf32, #tpu.memory_space<vmem>>, %arg6: memref<1x16x1xf32, #tpu.memory_space<vmem>>) attributes {dimension_semantics = [#tpu.dimension_semantics<parallel>, #tpu.dimension_semantics<arbitrary>], iteration_bounds = array<i64: 1, 1>, scalar_prefetch = 0 : i64, scratch_operands = 0 : i64, tpu.core_type = #tpu.core_type<tc>, window_params = [{transform_indices = @transform_0, window_bounds = array<i64: 16, 128>}, {transform_indices = @transform_1, window_bounds = array<i64: 16, 128>}, {transform_indices = @transform_2, window_bounds = array<i64: 1, 16, 1>}, {transform_indices = @transform_3, window_bounds = array<i64: 1, 16, 1>}, {transform_indices = @transform_4, window_bounds = array<i64: 1, 16, 1>}]} {
    %c0_i32 = arith.constant 0 : i32
    %0 = arith.cmpi eq, %arg1, %c0_i32 : i32
    %1 = arith.extui %0 : i1 to i32
    %c0_i32_0 = arith.constant 0 : i32
    %2 = arith.cmpi ne, %1, %c0_i32_0 : i32
    scf.if %2 {
      %cst_29 = arith.constant 0.000000e+00 : f32
      %49 = vector.broadcast %cst_29 : f32 to vector<16x1xf32>
      %c0_30 = arith.constant 0 : index
      %c0_31 = arith.constant 0 : index
      %c0_32 = arith.constant 0 : index
      %50 = vector.load %arg4[%c0_30, %c0_31, %c0_32] : memref<1x16x1xf32, #tpu.memory_space<vmem>>, vector<1x16x1xf32>
      %51 = vector.shape_cast %50 : vector<1x16x1xf32> to vector<16x1xf32>
      %52 = vector.shape_cast %49 : vector<16x1xf32> to vector<1x16x1xf32>
      tpu.vector_store %arg4[%c0_30, %c0_31, %c0_32], %52 {strides = array<i32>} : memref<1x16x1xf32, #tpu.memory_space<vmem>>, vector<1x16x1xf32>,
      %cst_33 = arith.constant 0.000000e+00 : f32
      %53 = vector.broadcast %cst_33 : f32 to vector<16x1xf32>
      %c0_34 = arith.constant 0 : index
      %c0_35 = arith.constant 0 : index
      %c0_36 = arith.constant 0 : index
      %54 = vector.load %arg5[%c0_34, %c0_35, %c0_36] : memref<1x16x1xf32, #tpu.memory_space<vmem>>, vector<1x16x1xf32>
      %55 = vector.shape_cast %54 : vector<1x16x1xf32> to vector<16x1xf32>
      %56 = vector.shape_cast %53 : vector<16x1xf32> to vector<1x16x1xf32>
      tpu.vector_store %arg5[%c0_34, %c0_35, %c0_36], %56 {strides = array<i32>} : memref<1x16x1xf32, #tpu.memory_space<vmem>>, vector<1x16x1xf32>,
      %cst_37 = arith.constant 0.000000e+00 : f32
      %57 = vector.broadcast %cst_37 : f32 to vector<16x1xf32>
      %c0_38 = arith.constant 0 : index
      %c0_39 = arith.constant 0 : index
      %c0_40 = arith.constant 0 : index
      %58 = vector.load %arg6[%c0_38, %c0_39, %c0_40] : memref<1x16x1xf32, #tpu.memory_space<vmem>>, vector<1x16x1xf32>
      %59 = vector.shape_cast %58 : vector<1x16x1xf32> to vector<16x1xf32>
      %60 = vector.shape_cast %57 : vector<16x1xf32> to vector<1x16x1xf32>
      tpu.vector_store %arg6[%c0_38, %c0_39, %c0_40], %60 {strides = array<i32>} : memref<1x16x1xf32, #tpu.memory_space<vmem>>, vector<1x16x1xf32>,
    } else {
    }
    %c0 = arith.constant 0 : index
    %c0_1 = arith.constant 0 : index
    %3 = vector.load %arg2[%c0, %c0_1] : memref<16x128xf32, #tpu.memory_space<vmem>>, vector<16x128xf32>
    %c0_2 = arith.constant 0 : index
    %c0_3 = arith.constant 0 : index
    %4 = vector.load %arg3[%c0_2, %c0_3] : memref<16x128xf32, #tpu.memory_space<vmem>>, vector<16x128xf32>
    %5 = math.absf %3 : vector<16x128xf32>
    %cst = arith.constant 0.000000e+00 : f32
    %6 = vector.broadcast %cst : f32 to vector<16x128xf32>
    %7 = arith.subf %6, %5 : vector<16x128xf32>
    %8 = math.exp %7 : vector<16x128xf32>
    %cst_4 = arith.constant 0.000000e+00 : f32
    %9 = vector.broadcast %cst_4 : f32 to vector<16x128xf32>
    %10 = arith.maximumf %3, %9 : vector<16x128xf32>
    %11 = arith.mulf %3, %4 : vector<16x128xf32>
    %12 = arith.subf %10, %11 : vector<16x128xf32>
    %13 = math.log1p %8 : vector<16x128xf32>
    %14 = arith.addf %12, %13 : vector<16x128xf32>
    %cst_5 = arith.constant 0.000000e+00 : f32
    %15 = vector.broadcast %cst_5 : f32 to vector<16x128xf32>
    %16 = arith.cmpf oge, %3, %15 : vector<16x128xf32>
    %cst_6 = arith.constant 1.000000e+00 : f32
    %17 = vector.broadcast %cst_6 : f32 to vector<16x128xf32>
    %18 = arith.select %16, %17, %8 : vector<16x128xi1>, vector<16x128xf32>
    %cst_7 = arith.constant 1.000000e+00 : f32
    %19 = vector.broadcast %cst_7 : f32 to vector<16x128xf32>
    %20 = arith.addf %19, %8 : vector<16x128xf32>
    %21 = tpu.reciprocal %20 {approx = true} : vector<16x128xf32> -> vector<16x128xf32>
    %22 = arith.mulf %18, %21 : vector<16x128xf32>
    %23 = arith.mulf %22, %4 : vector<16x128xf32>
    %24 = arith.addf %22, %4 : vector<16x128xf32>
    %c0_8 = arith.constant 0 : index
    %c0_9 = arith.constant 0 : index
    %c0_10 = arith.constant 0 : index
    %25 = vector.load %arg4[%c0_8, %c0_9, %c0_10] : memref<1x16x1xf32, #tpu.memory_space<vmem>>, vector<1x16x1xf32>
    %26 = vector.shape_cast %25 : vector<1x16x1xf32> to vector<16x1xf32>
    %cst_11 = arith.constant dense<0.000000e+00> : vector<16xf32>
    %27 = vector.multi_reduction <add>, %14, %cst_11 [1] : vector<16x128xf32> to vector<16xf32>
    %28 = vector.shape_cast %27 : vector<16xf32> to vector<16x1xf32>
    %29 = arith.addf %26, %28 : vector<16x1xf32>
    %c0_12 = arith.constant 0 : index
    %c0_13 = arith.constant 0 : index
    %c0_14 = arith.constant 0 : index
    %30 = vector.load %arg4[%c0_12, %c0_13, %c0_14] : memref<1x16x1xf32, #tpu.memory_space<vmem>>, vector<1x16x1xf32>
    %31 = vector.shape_cast %30 : vector<1x16x1xf32> to vector<16x1xf32>
    %32 = vector.shape_cast %29 : vector<16x1xf32> to vector<1x16x1xf32>
    tpu.vector_store %arg4[%c0_12, %c0_13, %c0_14], %32 {strides = array<i32>} : memref<1x16x1xf32, #tpu.memory_space<vmem>>, vector<1x16x1xf32>,
    %c0_15 = arith.constant 0 : index
    %c0_16 = arith.constant 0 : index
    %c0_17 = arith.constant 0 : index
    %33 = vector.load %arg5[%c0_15, %c0_16, %c0_17] : memref<1x16x1xf32, #tpu.memory_space<vmem>>, vector<1x16x1xf32>
    %34 = vector.shape_cast %33 : vector<1x16x1xf32> to vector<16x1xf32>
    %cst_18 = arith.constant dense<0.000000e+00> : vector<16xf32>
    %35 = vector.multi_reduction <add>, %23, %cst_18 [1] : vector<16x128xf32> to vector<16xf32>
    %36 = vector.shape_cast %35 : vector<16xf32> to vector<16x1xf32>
    %37 = arith.addf %34, %36 : vector<16x1xf32>
    %c0_19 = arith.constant 0 : index
    %c0_20 = arith.constant 0 : index
    %c0_21 = arith.constant 0 : index
    %38 = vector.load %arg5[%c0_19, %c0_20, %c0_21] : memref<1x16x1xf32, #tpu.memory_space<vmem>>, vector<1x16x1xf32>
    %39 = vector.shape_cast %38 : vector<1x16x1xf32> to vector<16x1xf32>
    %40 = vector.shape_cast %37 : vector<16x1xf32> to vector<1x16x1xf32>
    tpu.vector_store %arg5[%c0_19, %c0_20, %c0_21], %40 {strides = array<i32>} : memref<1x16x1xf32, #tpu.memory_space<vmem>>, vector<1x16x1xf32>,
    %c0_22 = arith.constant 0 : index
    %c0_23 = arith.constant 0 : index
    %c0_24 = arith.constant 0 : index
    %41 = vector.load %arg6[%c0_22, %c0_23, %c0_24] : memref<1x16x1xf32, #tpu.memory_space<vmem>>, vector<1x16x1xf32>
    %42 = vector.shape_cast %41 : vector<1x16x1xf32> to vector<16x1xf32>
    %cst_25 = arith.constant dense<0.000000e+00> : vector<16xf32>
    %43 = vector.multi_reduction <add>, %24, %cst_25 [1] : vector<16x128xf32> to vector<16xf32>
    %44 = vector.shape_cast %43 : vector<16xf32> to vector<16x1xf32>
    %45 = arith.addf %42, %44 : vector<16x1xf32>
    %c0_26 = arith.constant 0 : index
    %c0_27 = arith.constant 0 : index
    %c0_28 = arith.constant 0 : index
    %46 = vector.load %arg6[%c0_26, %c0_27, %c0_28] : memref<1x16x1xf32, #tpu.memory_space<vmem>>, vector<1x16x1xf32>
    %47 = vector.shape_cast %46 : vector<1x16x1xf32> to vector<16x1xf32>
    %48 = vector.shape_cast %45 : vector<16x1xf32> to vector<1x16x1xf32>
    tpu.vector_store %arg6[%c0_26, %c0_27, %c0_28], %48 {strides = array<i32>} : memref<1x16x1xf32, #tpu.memory_space<vmem>>, vector<1x16x1xf32>,
    return
  }
  func.func @transform_0(%arg0: i32, %arg1: i32) -> (i32, i32) {
    %c1_i32 = arith.constant 1 : i32
    %0 = arith.muli %arg0, %c1_i32 : i32
    %1 = arith.addi %0, %arg1 : i32
    %c0_i32 = arith.constant 0 : i32
    %c0_i32_0 = arith.constant 0 : i32
    return %c0_i32, %1 : i32, i32
  }
  func.func @transform_1(%arg0: i32, %arg1: i32) -> (i32, i32) {
    %c1_i32 = arith.constant 1 : i32
    %0 = arith.muli %arg0, %c1_i32 : i32
    %1 = arith.addi %0, %arg1 : i32
    %c0_i32 = arith.constant 0 : i32
    %c0_i32_0 = arith.constant 0 : i32
    return %c0_i32, %1 : i32, i32
  }
  func.func @transform_2(%arg0: i32, %arg1: i32) -> (i32, i32, i32) {
    %c0_i32 = arith.constant 0 : i32
    %c0_i32_0 = arith.constant 0 : i32
    %c0_i32_1 = arith.constant 0 : i32
    return %arg0, %c0_i32, %c0_i32_0 : i32, i32, i32
  }
  func.func @transform_3(%arg0: i32, %arg1: i32) -> (i32, i32, i32) {
    %c0_i32 = arith.constant 0 : i32
    %c0_i32_0 = arith.constant 0 : i32
    %c0_i32_1 = arith.constant 0 : i32
    return %arg0, %c0_i32, %c0_i32_0 : i32, i32, i32
  }
  func.func @transform_4(%arg0: i32, %arg1: i32) -> (i32, i32, i32) {
    %c0_i32 = arith.constant 0 : i32
    %c0_i32_0 = arith.constant 0 : i32
    %c0_i32_1 = arith.constant 0 : i32
    return %arg0, %c0_i32, %c0_i32_0 : i32, i32, i32
  }
}

</mosaic_0001>

<bundles_post_ra>
// kernel: tpu_custom_call.1
= control target key start
LH: loop header
LB: loop body
LE: loop exit
PB: predicated region body
PF: predicated region fallthrough
CT: control target
= control target key end

     0   :  { %10 = vsyncpa [#allocation3], 0  ;;  %s343_s0 = inlined_call_operand.hbm [shape: f32[16,128], index: 0, kind: input, shape index: {}]   ;;  %s344_s1 = inlined_call_operand.hbm [shape: f32[16,128], index: 1, kind: input, shape index: {}]   ;;  %s345_s2 = inlined_call_operand.vmem [shape: f32[1,16,1], index: 2, kind: output, shape index: {0}]   ;;  %s346_s3 = inlined_call_operand.vmem [shape: f32[1,16,1], index: 3, kind: output, shape index: {1}]   ;;  %s347_s4 = inlined_call_operand.vmem [shape: f32[1,16,1], index: 4, kind: output, shape index: {2}]  }
   0x1   :  { %11 = vsyncpa [#allocation5], 0  ;;  %s223_s15 = smov [#allocation2]   ;;  %s175_s19 = scalar_lea.hbm %s343_s0, 256 }
   0x2   :  { %s20_s16 = sshll.u32 %s223_s15, 4  ;;  %p176_p0 = scmp.ne.s32.totalorder %s343_s0, %s175_s19  ;;  %s21_s16 = int_to_ptr.vmem [resolvable:$true] %s20_s16 }
   0x3   :  { %p179_p1 = scmp.lt.u32.totalorder %s175_s19, %s343_s0 }
   0x5   :  { %p181_p2 = pnand %p179_p1, %p176_p0 }
   0x7   :  { %184 = shalt.err (!%p181_p2)
}
   0x8   :  { %s185_s24 = scalar_lea.vmem %s21_s16, 256  ;;  %p190_p4 = scmp.lt.s32.totalorder %s21_s16, %s21_s16 }
   0x9   :  { %p186_p3 = scmp.ne.s32.totalorder %s21_s16, %s185_s24  ;;  %p191_p5 = scmp.lt.s32.totalorder %s185_s24, %s185_s24 }
   0xb   :  { %p192_p6 = por %p191_p5, %p190_p4 }
   0xd   :  { %p193_p7 = pnand %p192_p6, %p186_p3 }
   0xf   :  { %196 = shalt.err (!%p193_p7)
}
  0x10   :  { %s224_s25 = smov 128   ;;  %s225_s26 = smov 8  }
  0x11   :  { %26 = dma.hbm_to_vmem [thread:$0]  %s343_s0, 256, %s21_s16, [#allocation3], %s224_s25, %s224_s25, %s225_s26  }
  0x12   :  { %s226_s29 = smov [#allocation4]   ;;  %s197_s7 = scalar_lea.hbm %s344_s1, 256 }
  0x13   :  { %s35_s30 = sshll.u32 %s226_s29, 4  ;;  %p198_p8 = scmp.ne.s32.totalorder %s344_s1, %s197_s7  ;;  %s36_s30 = int_to_ptr.vmem [resolvable:$true] %s35_s30 }
  0x14   :  { %p201_p9 = scmp.lt.u32.totalorder %s197_s7, %s344_s1 }
  0x16   :  { %p203_p10 = pnand %p201_p9, %p198_p8 }
  0x18   :  { %206 = shalt.err (!%p203_p10)
}
  0x19   :  { %s207_s12 = scalar_lea.vmem %s36_s30, 256  ;;  %p212_p12 = scmp.lt.s32.totalorder %s36_s30, %s36_s30 }
  0x1a   :  { %p208_p11 = scmp.ne.s32.totalorder %s36_s30, %s207_s12  ;;  %p213_p13 = scmp.lt.s32.totalorder %s207_s12, %s207_s12 }
  0x1c   :  { %p214_p0 = por %p213_p13, %p212_p12 }
  0x1e   :  { %p215_p1 = pnand %p214_p0, %p208_p11 }
  0x20   :  { %218 = shalt.err (!%p215_p1)
}
  0x21   :  { %41 = dma.hbm_to_vmem [thread:$0]  %s344_s1, 256, %s36_s30, [#allocation5], %s224_s25, %s224_s25, %s225_s26  }
  0x22   :  { %219 = dma.done.wait [#allocation3], 256  }
  0x23   :  { %220 = vsyncadd [#allocation3], 4294967040 }
  0x24   :  { %221 = dma.done.wait [#allocation5], 256  }
  0x25   :  { %222 = vsyncadd [#allocation5], 4294967040  ;;  %vm54_vm0 = vcmask 7168   ;;  %v227_v0 = vmov 0.0   ;;  %v61_v1 = vld [vmem:[#allocation2] sm:$0xff]  ;;  %v62_v2 = vld [vmem:[#allocation2 + $0x8] sm:$0xff] }
  0x26   :  { %57 = vst.msk [vmem:[%s346_s3] sm:$0xff] %vm54_vm0, %v227_v0  ;;  %55 = vst.msk [vmem:[%s345_s2] sm:$0xff] %vm54_vm0, %v227_v0  ;;  %v65_v3 = vand.u32 2147483647, %v61_v1  ;;  %v66_v4 = vand.u32 2147483647, %v62_v2 }
  0x27   :  { %56 = vst.msk [vmem:[%s345_s2 + $0x8] sm:$0xff] %vm54_vm0, %v227_v0  ;;  %58 = vst.msk [vmem:[%s346_s3 + $0x8] sm:$0xff] %vm54_vm0, %v227_v0  ;;  %v63_v14 = vld [vmem:[#allocation4] sm:$0xff]  ;;  %vm99_vm1 = vcmp.ge.f32.partialorder %v61_v1, 0.0  ;;  %v64_v17 = vld [vmem:[#allocation4 + $0x8] sm:$0xff]  ;;  %v73_v18 = vmax.f32 %v61_v1, 0.0 }
  0x28   :  { %59 = vst.msk [vmem:[%s347_s4] sm:$0xff] %vm54_vm0, %v227_v0  ;;  %60 = vst.msk [vmem:[%s347_s4 + $0x8] sm:$0xff] %vm54_vm0, %v227_v0  ;;  %v67_v5 = vsub.f32 0.0, %v65_v3  ;;  %v68_v6 = vsub.f32 0.0, %v66_v4  ;;  %v75_v19 = vmul.f32 %v63_v14, %v61_v1  ;;  %vm100_vm2 = vcmp.ge.f32.partialorder %v62_v2, 0.0 }
  0x29   :  { %v74_v23 = vmax.f32 %v62_v2, 0.0  ;;  %v76_v24 = vmul.f32 %v64_v17, %v62_v2 }
  0x2a   :  { %v69_v7 = vmul.f32 1.442695, %v67_v5  ;;  %v71_v8 = vmul.f32 1.442695, %v68_v6  ;;  %v77_v31 = vsub.f32 %v73_v18, %v75_v19 }
  0x2b   :  { %v78_v38 = vsub.f32 %v74_v23, %v76_v24 }
  0x2c   :  { %163 = vpow2.f32 %v69_v7 }
  0x2d   :  { %165 = vpow2.f32 %v71_v8  ;;  %v124_v47 = vld [vmem:[%s346_s3] sm:$0xff] }
  0x2e   :  { %v113_v49 = vld [vmem:[%s345_s2] sm:$0xff]  ;;  %v125_v52 = vld [vmem:[%s346_s3 + $0x8] sm:$0xff] }
  0x2f   :  { %v114_v55 = vld [vmem:[%s345_s2 + $0x8] sm:$0xff]  ;;  %v134_v61 = vld [vmem:[%s347_s4] sm:$0xff] }
  0x30   :  { %v135_v58 = vld [vmem:[%s347_s4 + $0x8] sm:$0xff] }
  0x36   :  { %v164_v9 = vpop.eup %163 }
  0x37   :  { %v166_v10 = vpop.eup %165  ;;  %v79_v11 = vadd.f32 1.0, %v164_v9  ;;  %v82_v13 = vmul.f32 -0.5, %v164_v9  ;;  %v85_v20 = vand.u32 2147483647, %v164_v9  ;;  %v101_v21 = vsel %vm99_vm1, 1.0, %v164_v9 }
  0x38   :  { %v88_v12 = vadd.f32 1.0, %v166_v10  ;;  %v91_v15 = vmul.f32 -0.5, %v166_v10  ;;  %v94_v25 = vand.u32 2147483647, %v166_v10  ;;  %v102_v28 = vsel %vm100_vm2, 1.0, %v166_v10 }
  0x39   :  { %167 = vrcp.f32 %v79_v11  ;;  %v83_v16 = vadd.f32 1.0, %v82_v13  ;;  %vm86_vm3 = vcmp.lt.f32.partialorder %v85_v20, 0.0004427343 }
  0x3a   :  { %169 = vlog2.f32 %v79_v11  ;;  %v92_v22 = vadd.f32 1.0, %v91_v15  ;;  %vm95_vm4 = vcmp.lt.f32.partialorder %v94_v25, 0.0004427343 }
  0x3b   :  { %171 = vrcp.f32 %v88_v12  ;;  %v84_v27 = vmul.f32 %v164_v9, %v83_v16 }
  0x3c   :  { %173 = vlog2.f32 %v88_v12  ;;  %v93_v34 = vmul.f32 %v166_v10, %v92_v22 }
  0x43   :  { %v168_v26 = vpop.eup %167 }
  0x44   :  { %v170_v29 = vpop.eup %169  ;;  %v107_v30 = vmul.f32 %v168_v26, %v101_v21 }
  0x45   :  { %v172_v32 = vpop.eup %171  ;;  %v81_v33 = vmul.f32 0.6931472, %v170_v29 }
  0x46   :  { %v174_v35 = vpop.eup %173  ;;  %v109_v36 = vmul.f32 %v107_v30, %v63_v14  ;;  %v108_v37 = vmul.f32 %v172_v32, %v102_v28  ;;  %v111_v46 = vadd.f32 %v107_v30, %v63_v14 }
  0x47   :  { %v87_v39 = vsel %vm86_vm3, %v84_v27, %v81_v33  ;;  %v90_v40 = vmul.f32 0.6931472, %v174_v35 }
  0x48   :  { %126 = vadd.xlane.f32.xlu1 %v109_v36  ;;  %v97_v41 = vadd.f32 %v87_v39, %v77_v31  ;;  %v110_v42 = vmul.f32 %v108_v37, %v64_v17  ;;  %v112_v45 = vadd.f32 %v108_v37, %v64_v17 }
  0x49   :  { %v96_v43 = vsel %vm95_vm4, %v93_v34, %v90_v40 }
  0x4a   :  { %115 = vadd.xlane.f32.xlu0 %v97_v41  ;;  %v98_v44 = vadd.f32 %v96_v43, %v78_v38 }
  0x4c   :  { %128 = vadd.xlane.f32.xlu1 %v110_v42 }
  0x4e   :  { %117 = vadd.xlane.f32.xlu0 %v98_v44 }
  0x50   :  { %138 = vadd.xlane.f32.xlu1 %v112_v45 }
  0x52   :  { %136 = vadd.xlane.f32.xlu0 %v111_v46 }
  0xd5   :  { %v127_v48 = vpop.xlane.xlu1 %126 }
  0xd6   :  { %v130_v50 = vadd.f32 %v127_v48, %v124_v47 }
  0xd7   :  { %v116_v51 = vpop.xlane.xlu0 %115 }
  0xd8   :  { %132 = vst.msk [vmem:[%s346_s3] sm:$0xff] %vm54_vm0, %v130_v50  ;;  %v119_v53 = vadd.f32 %v116_v51, %v113_v49 }
  0xd9   :  { %v129_v54 = vpop.xlane.xlu1 %128 }
  0xda   :  { %122 = vst.msk [vmem:[%s345_s2] sm:$0xff] %vm54_vm0, %v119_v53  ;;  %v131_v56 = vadd.f32 %v129_v54, %v125_v52 }
  0xdb   :  { %v118_v57 = vpop.xlane.xlu0 %117 }
  0xdc   :  { %133 = vst.msk [vmem:[%s346_s3 + $0x8] sm:$0xff] %vm54_vm0, %v131_v56  ;;  %v120_v59 = vadd.f32 %v118_v57, %v114_v55 }
  0xdd   :  { %v139_v60 = vpop.xlane.xlu1 %138 }
  0xde   :  { %123 = vst.msk [vmem:[%s345_s2 + $0x8] sm:$0xff] %vm54_vm0, %v120_v59  ;;  %v141_v62 = vadd.f32 %v139_v60, %v135_v58 }
  0xdf   :  { %v137_v63 = vpop.xlane.xlu0 %136 }
  0xe0   :  { %143 = vst.msk [vmem:[%s347_s4 + $0x8] sm:$0xff] %vm54_vm0, %v141_v62  ;;  %v140_v0 = vadd.f32 %v137_v63, %v134_v61 }
  0xe2   :  { %142 = vst.msk [vmem:[%s347_s4] sm:$0xff] %vm54_vm0, %v140_v0 }
  0xe3   :  { %156 = vsyncpa [#allocation3], 1 }
  0xe4   :  { %157 = vsyncpa [#allocation5], 1 }

</bundles_post_ra>
